<compile_context>
chip_gen: v7x
topology: tpu7x:2x2x1
jax: 0.10.0
libtpu: 0.0.40
codegen_flags: <defaults>
</compile_context>

<pallas_src>
import jax
import jax.numpy as jnp
from jax.experimental import pallas as pl
from jax.experimental.pallas import tpu as pltpu

_LANES = 128


def _dyt_kernel(alpha_ref, gamma_ref, beta_ref, x_ref, o_ref):
    # alpha_ref: SMEM (1,) f32 scalar
    # gamma_ref, beta_ref: VMEM (1, W) f32, broadcast over rows
    # x_ref, o_ref: VMEM (TM, W)
    alpha = alpha_ref[0]
    x = x_ref[...].astype(jnp.float32)
    y = gamma_ref[...] * jnp.tanh(alpha * x) + beta_ref[...]
    o_ref[...] = y.astype(o_ref.dtype)


def _sublane_multiple(dtype):
    # 8 sublanes for 32-bit, 16 for 16-bit, 32 for 8-bit dtypes.
    itemsize = jnp.dtype(dtype).itemsize
    return max(8, 8 * (4 // max(itemsize, 1)))


def dyt_forward(x, alpha, gamma, beta, *, target_tile_bytes=2 * 1024 * 1024):
    """DyT forward.  x: (..., C) channels-last, alpha: (1,), gamma/beta: (C,)."""
    orig_shape = x.shape
    C = orig_shape[-1]
    dtype = x.dtype
    itemsize = jnp.dtype(dtype).itemsize

    x2d = x.reshape(-1, C)
    M = x2d.shape[0]

    gamma_f = gamma.astype(jnp.float32)
    beta_f = beta.astype(jnp.float32)
    alpha_f = alpha.reshape(1).astype(jnp.float32)

    if C <= _LANES and _LANES % C == 0:
        # Fold k logical rows into one lane-dense 128-wide physical row.
        k = _LANES // C
        W = _LANES
        R = pl.cdiv(M, k)  # physical rows needed
        gamma_row = jnp.tile(gamma_f, (k,)).reshape(1, W)
        beta_row = jnp.tile(beta_f, (k,)).reshape(1, W)
    else:
        # Pad channels up to a multiple of 128 lanes (padding discarded below).
        k = None
        W = pl.cdiv(C, _LANES) * _LANES
        R = M
        gamma_row = jnp.concatenate(
            [gamma_f, jnp.ones((W - C,), jnp.float32)]).reshape(1, W)
        beta_row = jnp.concatenate(
            [beta_f, jnp.zeros((W - C,), jnp.float32)]).reshape(1, W)

    # Row tile: as large as the VMEM budget allows (~2 MiB per tile so
    # double-buffered x + out stays well under the v5e 16 MiB scoped default),
    # rounded to the sublane packing for the dtype, capped by the row count.
    sub = _sublane_multiple(dtype)
    tm = max(sub, (target_tile_bytes // (W * itemsize)) // sub * sub)
    tm = min(tm, pl.cdiv(R, sub) * sub)
    r_pad = pl.cdiv(R, tm) * tm

    # Zero-pad the stream into a lane-dense (r_pad, W) slab.
    if k is not None:
        flat = x2d.reshape(-1)
        flat = jnp.pad(flat, (0, r_pad * k * C - M * C))
        x_in = flat.reshape(r_pad, W)
    else:
        x_in = jnp.pad(x2d, ((0, r_pad - M), (0, W - C)))

    grid = (r_pad // tm,)

    out = pl.pallas_call(
        _dyt_kernel,
        out_shape=jax.ShapeDtypeStruct((r_pad, W), dtype),
        grid=grid,
        in_specs=[
            pl.BlockSpec(memory_space=pltpu.SMEM),       # alpha (scalar)
            pl.BlockSpec((1, W), lambda i: (0, 0)),      # gamma (resident)
            pl.BlockSpec((1, W), lambda i: (0, 0)),      # beta  (resident)
            pl.BlockSpec((tm, W), lambda i: (i, 0)),     # x tile
        ],
        out_specs=pl.BlockSpec((tm, W), lambda i: (i, 0)),
        compiler_params=pltpu.CompilerParams(
            dimension_semantics=("parallel",),
        ),
    )(alpha_f, gamma_row, beta_row, x_in)

    if k is not None:
        out = out.reshape(r_pad * k, C)[:M]
    else:
        out = out[:M, :C]
    return out.reshape(orig_shape)


def dyt_reference(x, alpha, gamma, beta):
    return gamma * jnp.tanh(alpha * x) + beta


if __name__ == "__main__":
    key = jax.random.PRNGKey(0)

    # Deterministic parameter init matching DyT.__init__:
    #   alpha = ones(1) * 0.5, gamma = ones(C), beta = zeros(C)
    num_features = 32
    init_alpha = 0.5
    alpha = jnp.ones((1,), dtype=jnp.float32) * init_alpha
    gamma = jnp.ones((num_features,), dtype=jnp.float32)
    beta = jnp.zeros((num_features,), dtype=jnp.float32)

    # Primary test: (batch=2, seq=8, hidden=32) channels-last, f32
    # (exercises the lane-folding path: 4 logical rows per 128-wide row).
    x = jax.random.normal(key, (2, 8, num_features), dtype=jnp.float32)
    y = jax.block_until_ready(dyt_forward(x, alpha, gamma, beta))
    y_ref = dyt_reference(x, alpha, gamma, beta)
    assert y.shape == x.shape and y.dtype == x.dtype
    assert jnp.allclose(y, y_ref, atol=1e-5, rtol=1e-5), "mismatch vs reference"

    # Secondary test: ragged rows + non-128-aligned channels (padded path).
    C2 = 200
    alpha2 = jnp.ones((1,), dtype=jnp.float32) * init_alpha
    gamma2 = jax.random.normal(jax.random.PRNGKey(1), (C2,), dtype=jnp.float32)
    beta2 = jax.random.normal(jax.random.PRNGKey(2), (C2,), dtype=jnp.float32)
    x2 = jax.random.normal(jax.random.PRNGKey(3), (3, 5, C2), dtype=jnp.float32)
    y2 = jax.block_until_ready(dyt_forward(x2, alpha2, gamma2, beta2))
    y2_ref = dyt_reference(x2, alpha2, gamma2, beta2)
    assert y2.shape == x2.shape and y2.dtype == x2.dtype
    assert jnp.allclose(y2, y2_ref, atol=1e-5, rtol=1e-5), "mismatch vs reference (padded path)"

    print("KERNEL_OK")
</pallas_src>

<mosaic_0001>
module attributes {stable_mosaic.version = 11 : i64} {
  func.func @_dyt_kernel(%arg0: i32, %arg1: memref<1xf32, #tpu.memory_space<smem>>, %arg2: memref<1x128xf32, #tpu.memory_space<vmem>>, %arg3: memref<1x128xf32, #tpu.memory_space<vmem>>, %arg4: memref<8x128xf32, #tpu.memory_space<vmem>>, %arg5: memref<8x128xf32, #tpu.memory_space<vmem>>) attributes {dimension_semantics = [#tpu.dimension_semantics<parallel>], iteration_bounds = array<i64: 1>, scalar_prefetch = 0 : i64, scratch_operands = 0 : i64, tpu.core_type = #tpu.core_type<tc>, window_params = [{transform_indices = @transform_0, window_bounds = array<i64: 1>}, {pipeline_mode = #tpu.pipeline_mode<synchronous>, transform_indices = @transform_1, window_bounds = array<i64: 1, 128>}, {pipeline_mode = #tpu.pipeline_mode<synchronous>, transform_indices = @transform_2, window_bounds = array<i64: 1, 128>}, {transform_indices = @transform_3, window_bounds = array<i64: 8, 128>}, {transform_indices = @transform_4, window_bounds = array<i64: 8, 128>}]} {
    %c0 = arith.constant 0 : index
    %0 = memref.load %arg1[%c0] : memref<1xf32, #tpu.memory_space<smem>>
    %c0_0 = arith.constant 0 : index
    %c0_1 = arith.constant 0 : index
    %1 = vector.load %arg4[%c0_0, %c0_1] : memref<8x128xf32, #tpu.memory_space<vmem>>, vector<8x128xf32>
    %c0_2 = arith.constant 0 : index
    %c0_3 = arith.constant 0 : index
    %2 = vector.load %arg2[%c0_2, %c0_3] : memref<1x128xf32, #tpu.memory_space<vmem>>, vector<1x128xf32>
    %3 = vector.broadcast %0 : f32 to vector<8x128xf32>
    %4 = arith.mulf %3, %1 : vector<8x128xf32>
    %5 = math.tanh %4 : vector<8x128xf32>
    %6 = vector.broadcast %2 : vector<1x128xf32> to vector<8x128xf32>
    %7 = arith.mulf %6, %5 : vector<8x128xf32>
    %c0_4 = arith.constant 0 : index
    %c0_5 = arith.constant 0 : index
    %8 = vector.load %arg3[%c0_4, %c0_5] : memref<1x128xf32, #tpu.memory_space<vmem>>, vector<1x128xf32>
    %9 = vector.broadcast %8 : vector<1x128xf32> to vector<8x128xf32>
    %10 = arith.addf %7, %9 : vector<8x128xf32>
    %c0_6 = arith.constant 0 : index
    %c0_7 = arith.constant 0 : index
    %11 = vector.load %arg5[%c0_6, %c0_7] : memref<8x128xf32, #tpu.memory_space<vmem>>, vector<8x128xf32>
    tpu.vector_store %arg5[%c0_6, %c0_7], %10 {strides = array<i32>} : memref<8x128xf32, #tpu.memory_space<vmem>>, vector<8x128xf32>,
    return
  }
  func.func @transform_0(%arg0: i32) -> i32 {
    %c0_i32 = arith.constant 0 : i32
    %c0_i32_0 = arith.constant 0 : i32
    return %c0_i32 : i32
  }
  func.func @transform_1(%arg0: i32) -> (i32, i32) {
    %c0_i32 = arith.constant 0 : i32
    %c0_i32_0 = arith.constant 0 : i32
    %c0_i32_1 = arith.constant 0 : i32
    return %c0_i32, %c0_i32_0 : i32, i32
  }
  func.func @transform_2(%arg0: i32) -> (i32, i32) {
    %c0_i32 = arith.constant 0 : i32
    %c0_i32_0 = arith.constant 0 : i32
    %c0_i32_1 = arith.constant 0 : i32
    return %c0_i32, %c0_i32_0 : i32, i32
  }
  func.func @transform_3(%arg0: i32) -> (i32, i32) {
    %c0_i32 = arith.constant 0 : i32
    %c0_i32_0 = arith.constant 0 : i32
    return %arg0, %c0_i32 : i32, i32
  }
  func.func @transform_4(%arg0: i32) -> (i32, i32) {
    %c0_i32 = arith.constant 0 : i32
    %c0_i32_0 = arith.constant 0 : i32
    return %arg0, %c0_i32 : i32, i32
  }
}

</mosaic_0001>

<bundles_post_ra>
// kernel: tpu_custom_call.1
= control target key start
LH: loop header
LB: loop body
LE: loop exit
PB: predicated region body
PF: predicated region fallthrough
CT: control target
= control target key end

     0   :  { %s134_s0 = inlined_call_operand.<no memory space> [shape: f32[1], index: 0, kind: input, shape index: {}]   ;;  %s135_s1 = inlined_call_operand.vmem [shape: f32[1,128], index: 1, kind: input, shape index: {}]   ;;  %s136_s2 = inlined_call_operand.vmem [shape: f32[1,128], index: 2, kind: input, shape index: {}]   ;;  %s137_s3 = inlined_call_operand.vmem [shape: f32[8,128], index: 3, kind: input, shape index: {}]   ;;  %s138_s4 = inlined_call_operand.hbm [shape: f32[8,128], index: 4, kind: output, shape index: {}]  }
   0x1   :  { %v20_v0 = vld [vmem:[%s137_s3] sm:$0xff]  ;;  %v22_v1 = vstv %s134_s0 }
   0x2   :  { %v23_v2 = vmul.f32 %v22_v1, %v20_v0 }
   0x3   :  { %10 = vsyncpa [#allocation4], 0  ;;  %v55_v3 = vld [vmem:[%s135_s1] ss:$0 sm:$0xff]  ;;  %s84_s23 = smov [#allocation3]  }
   0x4   :  { %58 = vtanh.f32 %v23_v2  ;;  %v56_v5 = vld [vmem:[%s136_s2] ss:$0 sm:$0xff]  ;;  %s47_s24 = sshll.u32 %s84_s23, 4  ;;  %s48_s24 = int_to_ptr.vmem [resolvable:$true] %s47_s24 }
   0x5   :  { %s60_s3 = scalar_lea.vmem %s48_s24, 128  ;;  %p65_p1 = scmp.lt.s32.totalorder %s48_s24, %s48_s24 }
   0x6   :  { %p61_p0 = scmp.ne.s32.totalorder %s48_s24, %s60_s3  ;;  %p66_p2 = scmp.lt.s32.totalorder %s60_s3, %s60_s3 }
   0x8   :  { %p67_p3 = por %p66_p2, %p65_p1 }
   0xa   :  { %p68_p4 = pnand %p67_p3, %p61_p0 }
   0xe   :  { %v59_v4 = vpop.eup %58 }
   0xf   :  { %v31_v6 = vmul.f32 %v59_v4, %v55_v3 }
  0x11   :  { %v39_v7 = vadd.f32 %v56_v5, %v31_v6 }
  0x13   :  { %40 = vst [vmem:[#allocation3] sm:$0xff] %v39_v7 }
  0x14   :  { %71 = shalt.err (!%p68_p4)
}
  0x15   :  { %s72_s25 = scalar_lea.hbm %s138_s4, 128 }
  0x16   :  { %p73_p5 = scmp.ne.s32.totalorder %s138_s4, %s72_s25  ;;  %p76_p6 = scmp.lt.u32.totalorder %s72_s25, %s138_s4 }
  0x18   :  { %p78_p7 = pnand %p76_p6, %p73_p5 }
  0x1a   :  { %81 = shalt.err (!%p78_p7)
}
  0x1b   :  { %50 = dma.vmem_to_hbm [thread:$0]  %s48_s24, 128, %s138_s4, [#allocation4]  }
  0x1c   :  { %82 = dma.done.wait [#allocation4], 128  }
  0x1d   :  { %83 = vsyncadd [#allocation4], 4294967168 }
  0x1e   :  { %54 = vsyncpa [#allocation4], 1 }

</bundles_post_ra>
